<compile_context>
chip_gen: v7x
topology: tpu7x:2x2x1
jax: 0.10.0
libtpu: 0.0.40
codegen_flags: <defaults>
</compile_context>

<pallas_src>
import functools

import jax
import jax.numpy as jnp
from jax.experimental import pallas as pl
from jax.experimental.pallas import tpu as pltpu


def _round_up(x, m):
    return ((x + m - 1) // m) * m


def _mtloss_kernel(logits_ref, tgt_ref, out_ref, *,
                   n_valid, tile, n_gender, n_race, n_age,
                   gender_w, race_w, age_w, inv_n):
    """Fused segmented softmax cross-entropy over one sample tile.

    logits_ref: (C, tile) class-major logits, C = n_gender + n_race + n_age.
                Rows [0:n_gender) = gender, [n_gender:n_gender+n_race) = race,
                rest = age.  Lanes are samples.
    tgt_ref:    (3, tile) int32 targets pre-offset into the packed class slab
                (row 0 = gender, row 1 = race, row 2 = age).
    out_ref:    (1, 1) f32 SMEM block -> this tile's weighted partial loss,
                already scaled by 1/N.
    """
    c_total = n_gender + n_race + n_age
    gw = jnp.float32(gender_w)
    rw = jnp.float32(race_w)
    aw = jnp.float32(age_w)
    neg_inf = jnp.float32(-jnp.inf)

    # Per-sample validity (handles the ragged last block; no wrapper padding).
    lane0 = pl.program_id(0) * tile
    sid = lane0 + jax.lax.broadcasted_iota(jnp.int32, (1, tile), 1)
    valid = sid < n_valid                                      # (1, tile)

    x = logits_ref[...].astype(jnp.float32)                    # (C, tile)
    x = jnp.where(valid, x, 0.0)                               # sanitize dead lanes

    row = jax.lax.broadcasted_iota(jnp.int32, (c_total, tile), 0)
    is_g = row < n_gender
    is_r = jnp.logical_and(row >= n_gender, row < n_gender + n_race)
    is_a = row >= n_gender + n_race

    # Exact per-sample, per-segment maxima via sublane-axis reductions.
    mg = jnp.max(jnp.where(is_g, x, neg_inf), axis=0, keepdims=True)   # (1, tile)
    mr = jnp.max(jnp.where(is_r, x, neg_inf), axis=0, keepdims=True)
    ma = jnp.max(jnp.where(is_a, x, neg_inf), axis=0, keepdims=True)

    # Broadcast each segment's max onto its own rows -> ONE exp over the slab.
    mx_b = jnp.where(is_g, mg, jnp.where(is_r, mr, ma))        # (C, tile)
    e = jnp.exp(x - mx_b)                                      # single EUP pass

    sg = jnp.sum(jnp.where(is_g, e, 0.0), axis=0, keepdims=True)
    sr = jnp.sum(jnp.where(is_r, e, 0.0), axis=0, keepdims=True)
    sa = jnp.sum(jnp.where(is_a, e, 0.0), axis=0, keepdims=True)

    lse_w = (gw * (jnp.log(sg) + mg)
             + rw * (jnp.log(sr) + mr)
             + aw * (jnp.log(sa) + ma))                        # (1, tile)

    # Fused weighted target-logit gather (targets pre-offset into the slab).
    tg = tgt_ref[0:1, :]
    tr_ = tgt_ref[1:2, :]
    ta_ = tgt_ref[2:3, :]
    sel_w = (jnp.where(row == tg, gw, 0.0)
             + jnp.where(row == tr_, rw, 0.0)
             + jnp.where(row == ta_, aw, 0.0))                 # (C, tile)
    wtgt = jnp.sum(sel_w * x, axis=0, keepdims=True)           # (1, tile)

    per_sample = jnp.where(valid, lse_w - wtgt, 0.0)
    out_ref[0, 0] = jnp.sum(per_sample) * jnp.float32(inv_n)


def _pick_tile(n, tile_samples):
    """Pick a legal lane-tile: multiple of 128, or the full sample extent."""
    tile_samples = max(128, _round_up(int(tile_samples), 128))
    if n % 128 == 0:
        tile = min(tile_samples, n)
    elif n > tile_samples:
        tile = tile_samples
    else:
        tile = n                       # single full-extent block (always legal)
    # Large single-block batches: split in two so v7x's 2 TensorCores both work.
    if n >= 2048 and tile >= n:
        tile = _round_up((n + 1) // 2, 128)
    return tile


def mt_loss_utkface(gender_pred, gender_gt, race_pred, race_gt,
                    age_pred, age_gt,
                    age_branch_w=0.2, race_branch_w=0.1, gender_branch_w=0.1,
                    tile_samples=4096):
    """Pallas implementation of MTLossUTKFace.forward (mean-reduced CE)."""
    n, n_gender = gender_pred.shape
    n_race = race_pred.shape[1]
    n_age = age_pred.shape[1]
    assert race_pred.shape[0] == n and age_pred.shape[0] == n
    c_total = n_gender + n_race + n_age

    # Class-major packing: classes on sublanes, samples on lanes (dense).
    logits_cm = jnp.concatenate(
        [gender_pred.T, race_pred.T, age_pred.T], axis=0)        # (C, N)
    tgt_cm = jnp.stack(
        [gender_gt.astype(jnp.int32),
         race_gt.astype(jnp.int32) + n_gender,
         age_gt.astype(jnp.int32) + n_gender + n_race], axis=0)  # (3, N)

    tile = _pick_tile(n, tile_samples)
    num_tiles = pl.cdiv(n, tile)

    kernel = functools.partial(
        _mtloss_kernel,
        n_valid=n, tile=tile,
        n_gender=n_gender, n_race=n_race, n_age=n_age,
        gender_w=gender_branch_w, race_w=race_branch_w, age_w=age_branch_w,
        inv_n=1.0 / float(n))

    cost = pl.CostEstimate(
        flops=int(12 * n * c_total),
        transcendentals=int(n * (c_total + 3)),
        bytes_accessed=int(n * c_total * logits_cm.dtype.itemsize
                           + n * 3 * 4 + num_tiles * 4))

    partials = pl.pallas_call(
        kernel,
        out_shape=jax.ShapeDtypeStruct((num_tiles, 1), jnp.float32),
        grid=(num_tiles,),
        in_specs=[
            pl.BlockSpec((c_total, tile), lambda i: (0, i)),
            pl.BlockSpec((3, tile), lambda i: (0, i)),
        ],
        out_specs=pl.BlockSpec((1, 1), lambda i: (i, 0),
                               memory_space=pltpu.SMEM),
        compiler_params=pltpu.CompilerParams(
            dimension_semantics=("parallel",)),
        cost_estimate=cost,
    )(logits_cm, tgt_cm)

    # Tiny (num_tiles,) reduction of per-tile weighted partial sums.
    return jnp.sum(partials)


def _reference(gender_pred, gender_gt, race_pred, race_gt, age_pred, age_gt,
               age_w=0.2, race_w=0.1, gender_w=0.1):
    def ce(logits, tgt):
        logits = logits.astype(jnp.float32)
        lse = jax.nn.logsumexp(logits, axis=-1)
        tgt_logit = jnp.take_along_axis(logits, tgt[:, None], axis=-1)[:, 0]
        return jnp.mean(lse - tgt_logit)
    return (age_w * ce(age_pred, age_gt)
            + race_w * ce(race_pred, race_gt)
            + gender_w * ce(gender_pred, gender_gt))


def _make_inputs(key, batch, n_gender, n_race, n_age):
    kg, kr, ka, ktg, ktr, kta = jax.random.split(key, 6)
    gender_pred = jax.random.normal(kg, (batch, n_gender), dtype=jnp.float32)
    race_pred = jax.random.normal(kr, (batch, n_race), dtype=jnp.float32)
    age_pred = jax.random.normal(ka, (batch, n_age), dtype=jnp.float32)
    gender_gt = jax.random.randint(ktg, (batch,), 0, n_gender, dtype=jnp.int32)
    race_gt = jax.random.randint(ktr, (batch,), 0, n_race, dtype=jnp.int32)
    age_gt = jax.random.randint(kta, (batch,), 0, n_age, dtype=jnp.int32)
    return gender_pred, gender_gt, race_pred, race_gt, age_pred, age_gt


if __name__ == "__main__":
    n_gender, n_race, n_age = 2, 5, 9
    key = jax.random.PRNGKey(0)
    k1, k2 = jax.random.split(key, 2)

    # Small batch: single full-extent block.
    args = _make_inputs(k1, 8, n_gender, n_race, n_age)
    loss = mt_loss_utkface(*args)
    loss = jax.block_until_ready(loss)
    ref = _reference(*args)
    assert jnp.allclose(loss, ref, rtol=1e-5, atol=1e-5), (loss, ref)

    # Multi-tile grid with a ragged last block (masked in-kernel, no padding).
    args2 = _make_inputs(k2, 200, n_gender, n_race, n_age)
    loss2 = mt_loss_utkface(*args2, tile_samples=128)
    loss2 = jax.block_until_ready(loss2)
    ref2 = _reference(*args2)
    assert jnp.allclose(loss2, ref2, rtol=1e-5, atol=1e-5), (loss2, ref2)

    print("KERNEL_OK")
</pallas_src>

<mosaic_0001>
module attributes {stable_mosaic.version = 11 : i64} {
  func.func @_mtloss_kernel(%arg0: i32, %arg1: memref<16x8xf32, #tpu.memory_space<vmem>>, %arg2: memref<3x8xi32, #tpu.memory_space<vmem>>, %arg3: memref<1x1xf32, #tpu.memory_space<smem>>) attributes {dimension_semantics = [#tpu.dimension_semantics<parallel>], iteration_bounds = array<i64: 1>, scalar_prefetch = 0 : i64, scratch_operands = 0 : i64, tpu.core_type = #tpu.core_type<tc>, window_params = [{transform_indices = @transform_0, window_bounds = array<i64: 16, 8>}, {transform_indices = @transform_1, window_bounds = array<i64: 3, 8>}, {transform_indices = @transform_2, window_bounds = array<i64: 1, 1>}]} {
    %c8_i32 = arith.constant 8 : i32
    %0 = arith.muli %arg0, %c8_i32 : i32
    %1 = tpu.iota {dimensions = array<i32: 1>} : vector<1x8xi32>
    %2 = vector.broadcast %0 : i32 to vector<1x8xi32>
    %3 = arith.addi %2, %1 : vector<1x8xi32>
    %c8_i32_0 = arith.constant 8 : i32
    %4 = vector.broadcast %c8_i32_0 : i32 to vector<1x8xi32>
    %5 = arith.cmpi slt, %3, %4 : vector<1x8xi32>
    %c0 = arith.constant 0 : index
    %c0_1 = arith.constant 0 : index
    %6 = vector.load %arg1[%c0, %c0_1] : memref<16x8xf32, #tpu.memory_space<vmem>>, vector<16x8xf32>
    %cst = arith.constant 0.000000e+00 : f32
    %7 = vector.shape_cast %5 : vector<1x8xi1> to vector<1x8xi1>
    %8 = vector.broadcast %7 : vector<1x8xi1> to vector<16x8xi1>
    %9 = vector.broadcast %cst : f32 to vector<16x8xf32>
    %10 = arith.select %8, %6, %9 : vector<16x8xi1>, vector<16x8xf32>
    %11 = tpu.iota {dimensions = array<i32: 0>} : vector<16x8xi32>
    %c2_i32 = arith.constant 2 : i32
    %12 = vector.broadcast %c2_i32 : i32 to vector<16x8xi32>
    %13 = arith.cmpi slt, %11, %12 : vector<16x8xi32>
    %c2_i32_2 = arith.constant 2 : i32
    %14 = vector.broadcast %c2_i32_2 : i32 to vector<16x8xi32>
    %15 = arith.cmpi sge, %11, %14 : vector<16x8xi32>
    %c7_i32 = arith.constant 7 : i32
    %16 = vector.broadcast %c7_i32 : i32 to vector<16x8xi32>
    %17 = arith.cmpi slt, %11, %16 : vector<16x8xi32>
    %18 = arith.andi %15, %17 : vector<16x8xi1>
    %c7_i32_3 = arith.constant 7 : i32
    %19 = vector.broadcast %c7_i32_3 : i32 to vector<16x8xi32>
    %20 = arith.cmpi sge, %11, %19 : vector<16x8xi32>
    %cst_4 = arith.constant 0xFF800000 : f32
    %21 = vector.broadcast %cst_4 : f32 to vector<16x8xf32>
    %22 = arith.select %13, %10, %21 : vector<16x8xi1>, vector<16x8xf32>
    %cst_5 = arith.constant dense<0xFF800000> : vector<8xf32>
    %23 = vector.multi_reduction <maximumf>, %22, %cst_5 [0] : vector<16x8xf32> to vector<8xf32>
    %24 = vector.shape_cast %23 : vector<8xf32> to vector<1x8xf32>
    %cst_6 = arith.constant 0xFF800000 : f32
    %25 = vector.broadcast %cst_6 : f32 to vector<16x8xf32>
    %26 = arith.select %18, %10, %25 : vector<16x8xi1>, vector<16x8xf32>
    %cst_7 = arith.constant dense<0xFF800000> : vector<8xf32>
    %27 = vector.multi_reduction <maximumf>, %26, %cst_7 [0] : vector<16x8xf32> to vector<8xf32>
    %28 = vector.shape_cast %27 : vector<8xf32> to vector<1x8xf32>
    %cst_8 = arith.constant 0xFF800000 : f32
    %29 = vector.broadcast %cst_8 : f32 to vector<16x8xf32>
    %30 = arith.select %20, %10, %29 : vector<16x8xi1>, vector<16x8xf32>
    %cst_9 = arith.constant dense<0xFF800000> : vector<8xf32>
    %31 = vector.multi_reduction <maximumf>, %30, %cst_9 [0] : vector<16x8xf32> to vector<8xf32>
    %32 = vector.shape_cast %31 : vector<8xf32> to vector<1x8xf32>
    %33 = vector.shape_cast %28 : vector<1x8xf32> to vector<1x8xf32>
    %34 = vector.broadcast %33 : vector<1x8xf32> to vector<16x8xf32>
    %35 = vector.shape_cast %32 : vector<1x8xf32> to vector<1x8xf32>
    %36 = vector.broadcast %35 : vector<1x8xf32> to vector<16x8xf32>
    %37 = arith.select %18, %34, %36 : vector<16x8xi1>, vector<16x8xf32>
    %38 = vector.shape_cast %24 : vector<1x8xf32> to vector<1x8xf32>
    %39 = vector.broadcast %38 : vector<1x8xf32> to vector<16x8xf32>
    %40 = arith.select %13, %39, %37 : vector<16x8xi1>, vector<16x8xf32>
    %41 = arith.subf %10, %40 : vector<16x8xf32>
    %42 = math.exp %41 : vector<16x8xf32>
    %cst_10 = arith.constant 0.000000e+00 : f32
    %43 = vector.broadcast %cst_10 : f32 to vector<16x8xf32>
    %44 = arith.select %13, %42, %43 : vector<16x8xi1>, vector<16x8xf32>
    %cst_11 = arith.constant dense<0.000000e+00> : vector<8xf32>
    %45 = vector.multi_reduction <add>, %44, %cst_11 [0] : vector<16x8xf32> to vector<8xf32>
    %46 = vector.shape_cast %45 : vector<8xf32> to vector<1x8xf32>
    %cst_12 = arith.constant 0.000000e+00 : f32
    %47 = vector.broadcast %cst_12 : f32 to vector<16x8xf32>
    %48 = arith.select %18, %42, %47 : vector<16x8xi1>, vector<16x8xf32>
    %cst_13 = arith.constant dense<0.000000e+00> : vector<8xf32>
    %49 = vector.multi_reduction <add>, %48, %cst_13 [0] : vector<16x8xf32> to vector<8xf32>
    %50 = vector.shape_cast %49 : vector<8xf32> to vector<1x8xf32>
    %cst_14 = arith.constant 0.000000e+00 : f32
    %51 = vector.broadcast %cst_14 : f32 to vector<16x8xf32>
    %52 = arith.select %20, %42, %51 : vector<16x8xi1>, vector<16x8xf32>
    %cst_15 = arith.constant dense<0.000000e+00> : vector<8xf32>
    %53 = vector.multi_reduction <add>, %52, %cst_15 [0] : vector<16x8xf32> to vector<8xf32>
    %54 = vector.shape_cast %53 : vector<8xf32> to vector<1x8xf32>
    %55 = math.log %46 : vector<1x8xf32>
    %56 = arith.addf %55, %24 : vector<1x8xf32>
    %cst_16 = arith.constant 1.000000e-01 : f32
    %57 = vector.broadcast %cst_16 : f32 to vector<1x8xf32>
    %58 = arith.mulf %57, %56 : vector<1x8xf32>
    %59 = math.log %50 : vector<1x8xf32>
    %60 = arith.addf %59, %28 : vector<1x8xf32>
    %cst_17 = arith.constant 1.000000e-01 : f32
    %61 = vector.broadcast %cst_17 : f32 to vector<1x8xf32>
    %62 = arith.mulf %61, %60 : vector<1x8xf32>
    %63 = arith.addf %58, %62 : vector<1x8xf32>
    %64 = math.log %54 : vector<1x8xf32>
    %65 = arith.addf %64, %32 : vector<1x8xf32>
    %cst_18 = arith.constant 2.000000e-01 : f32
    %66 = vector.broadcast %cst_18 : f32 to vector<1x8xf32>
    %67 = arith.mulf %66, %65 : vector<1x8xf32>
    %68 = arith.addf %63, %67 : vector<1x8xf32>
    %c0_19 = arith.constant 0 : index
    %c0_20 = arith.constant 0 : index
    %69 = vector.load %arg2[%c0_19, %c0_20] : memref<3x8xi32, #tpu.memory_space<vmem>>, vector<1x8xi32>
    %c1 = arith.constant 1 : index
    %c0_21 = arith.constant 0 : index
    %70 = vector.load %arg2[%c1, %c0_21] : memref<3x8xi32, #tpu.memory_space<vmem>>, vector<1x8xi32>
    %c2 = arith.constant 2 : index
    %c0_22 = arith.constant 0 : index
    %71 = vector.load %arg2[%c2, %c0_22] : memref<3x8xi32, #tpu.memory_space<vmem>>, vector<1x8xi32>
    %72 = vector.broadcast %69 : vector<1x8xi32> to vector<16x8xi32>
    %73 = arith.cmpi eq, %11, %72 : vector<16x8xi32>
    %cst_23 = arith.constant 1.000000e-01 : f32
    %cst_24 = arith.constant 0.000000e+00 : f32
    %74 = vector.broadcast %cst_23 : f32 to vector<16x8xf32>
    %75 = vector.broadcast %cst_24 : f32 to vector<16x8xf32>
    %76 = arith.select %73, %74, %75 : vector<16x8xi1>, vector<16x8xf32>
    %77 = vector.broadcast %70 : vector<1x8xi32> to vector<16x8xi32>
    %78 = arith.cmpi eq, %11, %77 : vector<16x8xi32>
    %cst_25 = arith.constant 1.000000e-01 : f32
    %cst_26 = arith.constant 0.000000e+00 : f32
    %79 = vector.broadcast %cst_25 : f32 to vector<16x8xf32>
    %80 = vector.broadcast %cst_26 : f32 to vector<16x8xf32>
    %81 = arith.select %78, %79, %80 : vector<16x8xi1>, vector<16x8xf32>
    %82 = arith.addf %76, %81 : vector<16x8xf32>
    %83 = vector.broadcast %71 : vector<1x8xi32> to vector<16x8xi32>
    %84 = arith.cmpi eq, %11, %83 : vector<16x8xi32>
    %cst_27 = arith.constant 2.000000e-01 : f32
    %cst_28 = arith.constant 0.000000e+00 : f32
    %85 = vector.broadcast %cst_27 : f32 to vector<16x8xf32>
    %86 = vector.broadcast %cst_28 : f32 to vector<16x8xf32>
    %87 = arith.select %84, %85, %86 : vector<16x8xi1>, vector<16x8xf32>
    %88 = arith.addf %82, %87 : vector<16x8xf32>
    %89 = arith.mulf %88, %10 : vector<16x8xf32>
    %cst_29 = arith.constant dense<0.000000e+00> : vector<8xf32>
    %90 = vector.multi_reduction <add>, %89, %cst_29 [0] : vector<16x8xf32> to vector<8xf32>
    %91 = vector.shape_cast %90 : vector<8xf32> to vector<1x8xf32>
    %92 = arith.subf %68, %91 : vector<1x8xf32>
    %cst_30 = arith.constant 0.000000e+00 : f32
    %93 = vector.broadcast %cst_30 : f32 to vector<1x8xf32>
    %94 = arith.select %5, %92, %93 : vector<1x8xi1>, vector<1x8xf32>
    %95 = vector.shape_cast %94 : vector<1x8xf32> to vector<1x1x8xf32>
    %cst_31 = arith.constant dense<0.000000e+00> : vector<1xf32>
    %96 = vector.multi_reduction <add>, %95, %cst_31 [1, 2] : vector<1x1x8xf32> to vector<1xf32>
    %97 = vector.shape_cast %96 : vector<1xf32> to vector<1x1x1xf32>
    %98 = vector.extract %97[0, 0, 0] : f32 from vector<1x1x1xf32>
    %cst_32 = arith.constant 1.250000e-01 : f32
    %99 = arith.mulf %98, %cst_32 : f32
    %c0_33 = arith.constant 0 : index
    %c0_34 = arith.constant 0 : index
    %100 = memref.load %arg3[%c0_33, %c0_34] : memref<1x1xf32, #tpu.memory_space<smem>>
    memref.store %99, %arg3[%c0_33, %c0_34] : memref<1x1xf32, #tpu.memory_space<smem>>
    return
  }
  func.func @transform_0(%arg0: i32) -> (i32, i32) {
    %c0_i32 = arith.constant 0 : i32
    %c0_i32_0 = arith.constant 0 : i32
    return %c0_i32, %arg0 : i32, i32
  }
  func.func @transform_1(%arg0: i32) -> (i32, i32) {
    %c0_i32 = arith.constant 0 : i32
    %c0_i32_0 = arith.constant 0 : i32
    return %c0_i32, %arg0 : i32, i32
  }
  func.func @transform_2(%arg0: i32) -> (i32, i32) {
    %c0_i32 = arith.constant 0 : i32
    %c0_i32_0 = arith.constant 0 : i32
    return %arg0, %c0_i32 : i32, i32
  }
}

</mosaic_0001>

<bundles_post_ra>
// kernel: tpu_custom_call.1
= control target key start
LH: loop header
LB: loop body
LE: loop exit
PB: predicated region body
PF: predicated region fallthrough
CT: control target
= control target key end

     0   :  { %v13_v0 = vlaneseq  ;;  %s346_s0 = inlined_call_operand.vmem [shape: f32[16,8], index: 0, kind: input, shape index: {}]   ;;  %s347_s1 = inlined_call_operand.vmem [shape: s32[3,8], index: 1, kind: input, shape index: {}]   ;;  %s348_s2 = inlined_call_operand.hbm [shape: f32[1,1], index: 2, kind: output, shape index: {}]  }
   0x1   :  { %v18_v2 = vld [vmem:[%s346_s0] sm:$0xff]  ;;  %v19_v3 = vld [vmem:[%s346_s0 + $0x8] sm:$0xff] }
   0x2   :  { %v245_v1 = vand.u32 127, %v13_v0  ;;  %v253_v4 = vshrl.u32 %v13_v0, 7 }
   0x3   :  { %7 = vsyncpa [#allocation3], 0  ;;  %vm39_vm0 = vcmask 64512   ;;  %v199_v37 = vld [vmem:[%s347_s1] ss:$0 sm:$0xff]  ;;  %v228_v44 = vmov 0.0  }
   0x4   :  { %vm17_vm1 = vcmp.lt.s32.totalorder %v245_v1, 8  ;;  %vm27_vm2 = vcmp.lt.s32.totalorder %v253_v4, 2  ;;  %vm29_vm3 = vcmp.ge.s32.totalorder %v253_v4, 2  ;;  %vm31_vm4 = vcmp.lt.s32.totalorder %v253_v4, 7  ;;  %v200_v38 = vld [vmem:[%s347_s1 + $0x1] ss:$0 sm:$0xff] }
   0x5   :  { %v260_v5 = vsel %vm17_vm1, %v18_v2, 0.0  ;;  %v264_v6 = vsel %vm17_vm1, %v19_v3, 0.0  ;;  %vm35_vm5 = vcmp.ge.s32.totalorder %v253_v4, 7  ;;  %vm268_vm6 = vmand %vm29_vm3, %vm31_vm4  ;;  %v26_v34 = vadd.s32 8, %v253_v4  ;;  %v201_v43 = vld [vmem:[%s347_s1 + $0x2] ss:$0 sm:$0xff] }
   0x6   :  { %v37_v8 = vsel %vm27_vm2, %v260_v5, -inf  ;;  %v60_v9 = vsel %vm35_vm5, %v260_v5, -inf  ;;  %v63_v10 = vsel %vm39_vm0, %v264_v6, -inf  ;;  %v49_v12 = vsel %vm268_vm6, %v260_v5, -inf  ;;  %s216_s21 = scalar_lea.hbm %s348_s2, 16 }
   0x7   :  { %v40_v11 = vsel %vm39_vm0, %v37_v8, -inf  ;;  %v62_v13 = vsel %vm39_vm0, %v60_v9, -inf  ;;  %v51_v15 = vsel %vm39_vm0, %v49_v12, -inf  ;;  %vm135_vm7 = vcmp.eq.s32.totalorder %v253_v4, %v199_v37  ;;  %p217_p0 = scmp.ne.s32.totalorder %s348_s2, %s216_s21  ;;  %p220_p1 = scmp.lt.u32.totalorder %s216_s21, %s348_s2 }
   0x8   :  { %v43_v14 = vrot.slane %v40_v11, 4  ;;  %v64_v16 = vmax.f32 %v62_v13, %v63_v10  ;;  %v54_v17 = vrot.slane %v51_v15, 4  ;;  %vm143_vm8 = vcmp.eq.s32.totalorder %v253_v4, %v200_v38 }
   0x9   :  { %vm136_vm9 = vcmp.eq.s32.totalorder %v26_v34, %v199_v37  ;;  %vm144_vm10 = vcmp.eq.s32.totalorder %v26_v34, %v200_v38  ;;  %v137_v45 = vsel %vm135_vm7, 0.1, %v228_v44  ;;  %v145_v46 = vsel %vm143_vm8, 0.1, %v228_v44  ;;  %p222_p2 = pnand %p220_p1, %p217_p0 }
   0xa   :  { %v44_v18 = vmax.f32 %v40_v11, %v43_v14  ;;  %v65_v19 = vrot.slane %v64_v16, 4  ;;  %v55_v20 = vmax.f32 %v51_v15, %v54_v17  ;;  %v138_v47 = vsel %vm136_vm9, 0.1, %v228_v44 }
   0xb   :  { %v146_v48 = vsel %vm144_vm10, 0.1, %v228_v44  ;;  %vm153_vm11 = vcmp.eq.s32.totalorder %v253_v4, %v201_v43  ;;  %vm154_vm12 = vcmp.eq.s32.totalorder %v26_v34, %v201_v43  ;;  %v147_v49 = vadd.f32 %v145_v46, %v137_v45 }
   0xc   :  { %v45_v21 = vrot.slane %v44_v18, 2  ;;  %v66_v22 = vmax.f32 %v64_v16, %v65_v19  ;;  %v56_v23 = vrot.slane %v55_v20, 2  ;;  %v148_v50 = vadd.f32 %v146_v48, %v138_v47 }
   0xd   :  { %v155_v51 = vsel %vm153_vm11, 0.2, %v228_v44  ;;  %v156_v52 = vsel %vm154_vm12, 0.2, %v228_v44  ;;  %vm172_vm13 = vcmask 57344  }
   0xe   :  { %v46_v24 = vmax.f32 %v44_v18, %v45_v21  ;;  %v67_v25 = vrot.slane %v66_v22, 2  ;;  %v57_v26 = vmax.f32 %v55_v20, %v56_v23  ;;  %v157_v53 = vadd.f32 %v155_v51, %v147_v49 }
   0xf   :  { %v158_v55 = vadd.f32 %v156_v52, %v148_v50 }
  0x10   :  { %v47_v27 = vrot.slane %v46_v24, 1  ;;  %v68_v28 = vmax.f32 %v66_v22, %v67_v25  ;;  %v58_v29 = vrot.slane %v57_v26, 1  ;;  %v159_v61 = vmul.f32 %v157_v53, %v260_v5 }
  0x11   :  { %v160_v2 = vmul.f32 %v158_v55, %v264_v6 }
  0x12   :  { %v69_v30 = vrot.slane %v68_v28, 1  ;;  %v286_v31 = vmax.f32 %v46_v24, %v47_v27  ;;  %v288_v32 = vmax.f32 %v57_v26, %v58_v29  ;;  %v161_v12 = vsel %vm39_vm0, %v159_v61, 0.0 }
  0x13   :  { %v162_v4 = vsel %vm39_vm0, %v160_v2, 0.0 }
  0x14   :  { %v290_v33 = vmax.f32 %v68_v28, %v69_v30  ;;  %v163_v18 = vadd.f32 %v162_v4, %v161_v12 }
  0x16   :  { %v71_v35 = vsel %vm268_vm6, %v288_v32, %v290_v33  ;;  %v76_v36 = vsub.f32 %v264_v6, %v290_v33  ;;  %v164_v24 = vrot.slane %v163_v18, 4 }
  0x17   :  { %v73_v39 = vsel %vm27_vm2, %v286_v31, %v71_v35 }
  0x18   :  { %v75_v40 = vsub.f32 %v260_v5, %v73_v39  ;;  %v79_v41 = vmul.f32 1.442695, %v76_v36  ;;  %v165_v26 = vadd.f32 %v164_v24, %v163_v18 }
  0x1a   :  { %v77_v42 = vmul.f32 1.442695, %v75_v40  ;;  %206 = vpow2.f32 %v79_v41  ;;  %v166_v27 = vrot.slane %v165_v26, 2 }
  0x1c   :  { %208 = vpow2.f32 %v77_v42  ;;  %v167_v29 = vadd.f32 %v166_v27, %v165_v26 }
  0x1e   :  { %v168_v40 = vrot.slane %v167_v29, 1 }
  0x20   :  { %v169_v46 = vadd.f32 %v168_v40, %v167_v29 }
  0x24   :  { %v207_v54 = vpop.eup %206 }
  0x25   :  { %v106_v57 = vsel %vm39_vm0, %v207_v54, 0.0 }
  0x26   :  { %v209_v56 = vpop.eup %208 }
  0x27   :  { %v81_v58 = vsel %vm27_vm2, %v209_v56, 0.0  ;;  %v92_v59 = vsel %vm268_vm6, %v209_v56, 0.0  ;;  %v103_v60 = vsel %vm35_vm5, %v209_v56, 0.0 }
  0x28   :  { %v83_v62 = vsel %vm39_vm0, %v81_v58, 0.0  ;;  %v94_v63 = vsel %vm39_vm0, %v92_v59, 0.0  ;;  %v105_v0 = vsel %vm39_vm0, %v103_v60, 0.0 }
  0x29   :  { %v86_v3 = vrot.slane %v83_v62, 4  ;;  %v97_v8 = vrot.slane %v94_v63, 4  ;;  %v107_v9 = vadd.f32 %v106_v57, %v105_v0 }
  0x2b   :  { %v87_v10 = vadd.f32 %v86_v3, %v83_v62  ;;  %v98_v11 = vadd.f32 %v97_v8, %v94_v63  ;;  %v108_v7 = vrot.slane %v107_v9, 4 }
  0x2d   :  { %v88_v13 = vrot.slane %v87_v10, 2  ;;  %v99_v5 = vrot.slane %v98_v11, 2  ;;  %v109_v14 = vadd.f32 %v108_v7, %v107_v9 }
  0x2f   :  { %v89_v15 = vadd.f32 %v88_v13, %v87_v10  ;;  %v100_v16 = vadd.f32 %v99_v5, %v98_v11  ;;  %v110_v17 = vrot.slane %v109_v14, 2 }
  0x31   :  { %v90_v19 = vrot.slane %v89_v15, 1  ;;  %v101_v20 = vrot.slane %v100_v16, 1  ;;  %v111_v6 = vadd.f32 %v110_v17, %v109_v14 }
  0x33   :  { %v91_v21 = vadd.f32 %v90_v19, %v89_v15  ;;  %v102_v22 = vadd.f32 %v101_v20, %v100_v16  ;;  %v112_v23 = vrot.slane %v111_v6, 1 }
  0x35   :  { %v113_v25 = vadd.f32 %v112_v23, %v111_v6  ;;  %210 = vlog2.f32 %v91_v21 }
  0x36   :  { %212 = vlog2.f32 %v102_v22 }
  0x37   :  { %214 = vlog2.f32 %v113_v25 }
  0x3f   :  { %v211_v28 = vpop.eup %210 }
  0x40   :  { %v213_v30 = vpop.eup %212  ;;  %v115_v34 = vmul.f32 0.6931472, %v211_v28 }
  0x41   :  { %v215_v35 = vpop.eup %214  ;;  %v119_v36 = vmul.f32 0.6931472, %v213_v30 }
  0x42   :  { %v116_v37 = vadd.f32 %v115_v34, %v286_v31  ;;  %v124_v38 = vmul.f32 0.6931472, %v215_v35 }
  0x43   :  { %v120_v39 = vadd.f32 %v119_v36, %v288_v32 }
  0x44   :  { %v117_v41 = vmul.f32 0.1, %v116_v37  ;;  %v125_v42 = vadd.f32 %v124_v38, %v290_v33 }
  0x45   :  { %v121_v43 = vmul.f32 0.1, %v120_v39 }
  0x46   :  { %v126_v44 = vmul.f32 0.2, %v125_v42 }
  0x47   :  { %v122_v45 = vadd.f32 %v121_v43, %v117_v41 }
  0x49   :  { %v127_v47 = vadd.f32 %v126_v44, %v122_v45 }
  0x4b   :  { %v170_v48 = vsub.f32 %v127_v47, %v169_v46 }
  0x4d   :  { %v171_v49 = vsel %vm17_vm1, %v170_v48, 0.0 }
  0x4e   :  { %v173_v50 = vsel %vm172_vm13, %v171_v49, 0.0 }
  0x4f   :  { %174 = vadd.xlane.f32.xlu0 %v173_v50 }
  0xdc   :  { %v175_v31 = vpop.xlane.xlu0 %174 }
  0xdd   :  { %v176_v51 = vrot.slane %v175_v31, 4 }
  0xdf   :  { %v177_v52 = vadd.f32 %v176_v51, %v175_v31 }
  0xe1   :  { %v178_v32 = vrot.slane %v177_v52, 2 }
  0xe3   :  { %v179_v53 = vadd.f32 %v178_v32, %v177_v52 }
  0xe5   :  { %v180_v54 = vrot.slane %v179_v53, 1 }
  0xe7   :  { %v181_v55 = vadd.f32 %v180_v54, %v179_v53 }
  0xe9   :  { %202 = vpush %v181_v55 }
 0x11a   :  { %s203_s1 = spop %202 }
 0x11b   :  { %s183_s18 = smul.f32 0.125, %s203_s1 }
 0x11d   :  { %185 = sst [smem:[#allocation2]] %s183_s18 }
 0x11e   :  { %225 = shalt.err (!%p222_p2)
}
 0x11f   :  { %s229_s26 = smov [#allocation2]  }
 0x120   :  { %193 = dma.smem_to_hbm %s229_s26, 16, %s348_s2, [#allocation3]  }
 0x121   :  { %226 = dma.done.wait [#allocation3], 16  }
 0x122   :  { %227 = vsyncadd [#allocation3], 4294967280 }
 0x123   :  { %197 = sfence }
 0x124   :  { %198 = vsyncpa [#allocation3], 1 }

</bundles_post_ra>
